<compile_context>
chip_gen: v6e
topology: v6e:2x2x1
jax: 0.10.0
libtpu: 0.0.40
codegen_flags: <defaults>
</compile_context>

<pallas_src>
import math

import jax
import jax.numpy as jnp
from jax.experimental import pallas as pl
from jax.experimental.pallas import tpu as pltpu


def _make_dma_kernel(seq_len: int, n_chunks: int):
    """Build a kernel that copies rows [0, seq_len) of the table into out[0]
    via bounded HBM->HBM DMA(s).  Chunk boundaries are static (trace-time)."""
    bounds = [(i * seq_len) // n_chunks for i in range(n_chunks + 1)]
    chunks = [(bounds[i], bounds[i + 1] - bounds[i])
              for i in range(n_chunks) if bounds[i + 1] > bounds[i]]

    def kernel(emb_hbm, out_hbm, sem):
        copies = []
        for c, (start, size) in enumerate(chunks):
            cp = pltpu.make_async_copy(
                emb_hbm.at[pl.ds(start, size), :],       # table rows [start, start+size)
                out_hbm.at[0, pl.ds(start, size), :],    # out[0, start:start+size, :]
                sem.at[c],
            )
            cp.start()
            copies.append(cp)
        # All chunks are in flight before the first wait -> concurrent DMAs.
        for cp in copies:
            cp.wait()

    return kernel, len(chunks)


def pos_embeddings_lookup(emb_table: jax.Array, seq_len: int) -> jax.Array:
    """Return emb_table[arange(seq_len)][None] == emb_table[:seq_len] as (1, S, H).

    Implemented as a single Pallas call with zero grid and explicit bounded
    HBM->HBM DMA copies (pure data movement: 2*S*H bytes, zero FLOPs, zero
    VMEM footprint).
    """
    vocab, hidden = emb_table.shape
    if not (0 < seq_len <= vocab):
        raise ValueError(f"seq_len={seq_len} must be in (0, {vocab}]")

    itemsize = jnp.dtype(emb_table.dtype).itemsize
    total_bytes = seq_len * hidden * itemsize
    # One DMA already sits at the HBM roofline for small/medium copies; for
    # larger ones issue a few concurrent DMAs so multiple descriptors are in
    # flight (helps saturate HBM bandwidth, incl. v7x's ~3.2 TB/s).
    one_mib = 1 << 20
    if total_bytes <= one_mib:
        n_chunks = 1
    else:
        n_chunks = min(4, seq_len, (total_bytes + one_mib - 1) // one_mib)

    kernel, n_chunks = _make_dma_kernel(seq_len, n_chunks)

    return pl.pallas_call(
        kernel,
        out_shape=jax.ShapeDtypeStruct((1, seq_len, hidden), emb_table.dtype),
        in_specs=[pl.BlockSpec(memory_space=pl.ANY)],   # raw HBM ref, no auto-DMA
        out_specs=pl.BlockSpec(memory_space=pl.ANY),    # written via explicit DMA
        scratch_shapes=[pltpu.SemaphoreType.DMA((n_chunks,))],
    )(emb_table)


def make_sinusoidal_table(hidden_size: int, para_limit: int) -> jax.Array:
    """Deterministic PE table, identical to the PyTorch __init__ construction
    (row 0 stays zero; sin/cos rows are shifted down by one)."""
    pe = jnp.zeros((para_limit + 1, hidden_size), dtype=jnp.float32)
    position = jnp.arange(0, para_limit, dtype=jnp.float32)[:, None]
    div_term = jnp.exp(
        jnp.arange(0, hidden_size, 2, dtype=jnp.float32)
        * (-math.log(10000.0) / hidden_size)
    )
    pe = pe.at[1:, 0::2].set(jnp.sin(position * div_term))
    pe = pe.at[1:, 1::2].set(jnp.cos(position * div_term))
    return pe


if __name__ == "__main__":
    # Toy config matching the module at small scale.
    hidden_size = 32
    para_limit = 64
    batch, seq = 2, 8

    key = jax.random.PRNGKey(0)
    # x is only consumed for its sequence length (x.size(1)) in forward.
    x = jax.random.randint(key, (batch, seq), minval=0, maxval=para_limit,
                           dtype=jnp.int32)

    pe_table = make_sinusoidal_table(hidden_size, para_limit)

    out = jax.block_until_ready(pos_embeddings_lookup(pe_table, x.shape[1]))
    ref = pe_table[jnp.arange(seq)][None, :, :]
    assert out.shape == (1, seq, hidden_size), out.shape
    assert out.dtype == pe_table.dtype
    assert jnp.array_equal(out, ref)

    # Stress config: seq_len == vocab (not a multiple of 8) and several MiB of
    # data -> exercises the multi-chunk concurrent-DMA path and full-table copy.
    hidden2, para2 = 256, 3000
    pe2 = make_sinusoidal_table(hidden2, para2)
    seq2 = para2 + 1  # 3001 rows == full table
    out2 = jax.block_until_ready(pos_embeddings_lookup(pe2, seq2))
    ref2 = pe2[jnp.arange(seq2)][None, :, :]
    assert out2.shape == (1, seq2, hidden2), out2.shape
    assert jnp.array_equal(out2, ref2)

    print("KERNEL_OK")
</pallas_src>

<mosaic_0001>
module attributes {stable_mosaic.version = 11 : i64} {
  func.func @kernel(%arg0: memref<65x32xf32, #tpu.memory_space<any>>, %arg1: memref<1x8x32xf32, #tpu.memory_space<any>>, %arg2: memref<1x!tpu.dma_semaphore, #tpu.memory_space<semaphore_mem>>) attributes {dimension_semantics = [], scalar_prefetch = 0 : i64, scratch_operands = 1 : i64, tpu.core_type = #tpu.core_type<tc>} {
    %c0_i32 = arith.constant 0 : i32
    %c0_i32_0 = arith.constant 0 : i32
    %c0_i32_1 = arith.constant 0 : i32
    %c0_i32_2 = arith.constant 0 : i32
    %0 = tpu.memref_slice %arg0[%c0_i32_1, %c0_i32_2] : memref<65x32xf32, #tpu.memory_space<any>> -> memref<8x32xf32, #tpu.memory_space<any>>
    %c0_i32_3 = arith.constant 0 : i32
    %c0_i32_4 = arith.constant 0 : i32
    %1 = tpu.memref_slice %arg1[%c0_i32, %c0_i32_3, %c0_i32_4] : memref<1x8x32xf32, #tpu.memory_space<any>> -> memref<1x8x32xf32, #tpu.memory_space<any>>
    %2 = tpu.memref_squeeze %1 : memref<1x8x32xf32, #tpu.memory_space<any>> -> memref<8x32xf32, #tpu.memory_space<any>>
    %3 = tpu.memref_slice %arg2[%c0_i32_0] : memref<1x!tpu.dma_semaphore, #tpu.memory_space<semaphore_mem>> -> memref<1x!tpu.dma_semaphore, #tpu.memory_space<semaphore_mem>>
    %4 = tpu.memref_squeeze %3 : memref<1x!tpu.dma_semaphore, #tpu.memory_space<semaphore_mem>> -> memref<!tpu.dma_semaphore, #tpu.memory_space<semaphore_mem>>
    tpu.enqueue_dma source(%0 : memref<8x32xf32, #tpu.memory_space<any>>) target(%2 : memref<8x32xf32, #tpu.memory_space<any>>) target_semaphore(%4 : memref<!tpu.dma_semaphore, #tpu.memory_space<semaphore_mem>>)
    %c0_i32_5 = arith.constant 0 : i32
    %c0_i32_6 = arith.constant 0 : i32
    %c0_i32_7 = arith.constant 0 : i32
    %c0_i32_8 = arith.constant 0 : i32
    %5 = tpu.memref_slice %arg0[%c0_i32_7, %c0_i32_8] : memref<65x32xf32, #tpu.memory_space<any>> -> memref<8x32xf32, #tpu.memory_space<any>>
    %c0_i32_9 = arith.constant 0 : i32
    %c0_i32_10 = arith.constant 0 : i32
    %6 = tpu.memref_slice %arg1[%c0_i32_5, %c0_i32_9, %c0_i32_10] : memref<1x8x32xf32, #tpu.memory_space<any>> -> memref<1x8x32xf32, #tpu.memory_space<any>>
    %7 = tpu.memref_squeeze %6 : memref<1x8x32xf32, #tpu.memory_space<any>> -> memref<8x32xf32, #tpu.memory_space<any>>
    %8 = tpu.memref_slice %arg2[%c0_i32_6] : memref<1x!tpu.dma_semaphore, #tpu.memory_space<semaphore_mem>> -> memref<1x!tpu.dma_semaphore, #tpu.memory_space<semaphore_mem>>
    %9 = tpu.memref_squeeze %8 : memref<1x!tpu.dma_semaphore, #tpu.memory_space<semaphore_mem>> -> memref<!tpu.dma_semaphore, #tpu.memory_space<semaphore_mem>>
    tpu.wait_dma2 semaphore(%9 : memref<!tpu.dma_semaphore, #tpu.memory_space<semaphore_mem>>) src(%5 : memref<8x32xf32, #tpu.memory_space<any>>) dst(%7 : memref<8x32xf32, #tpu.memory_space<any>>)
    return
  }
}

</mosaic_0001>

<bundles_post_ra>
// kernel: tpu_custom_call.1
= control target key start
LH: loop header
LB: loop body
LE: loop exit
PB: predicated region body
PF: predicated region fallthrough
CT: control target
= control target key end

     0   :  { %s65_s0 = inlined_call_operand.vmem [shape: f32[65,32], index: 0, kind: input, shape index: {}]   ;;  %s66_s1 = inlined_call_operand.hbm [shape: f32[1,8,32], index: 1, kind: output, shape index: {}]  }
   0x1   :  { %s13_s8 = sshll.u32 %s65_s0, 4  ;;  %s14_s8 = int_to_ptr.vmem [resolvable:$true] %s13_s8 }
   0x2   :  { %s27_s9 = scalar_lea.vmem %s14_s8, 128  ;;  %s31_s10 = scalar_lea.vmem %s14_s8, 1152 }
   0x3   :  { %p28_p0 = scmp.ne.s32.totalorder %s14_s8, %s27_s9  ;;  %p32_p1 = scmp.lt.s32.totalorder %s14_s8, %s14_s8 }
   0x4   :  { %p33_p2 = scmp.lt.s32.totalorder %s31_s10, %s27_s9 }
   0x6   :  { %p34_p3 = por %p33_p2, %p32_p1 }
   0x8   :  { %p35_p4 = pnand %p34_p3, %p28_p0 }
   0xa   :  { %38 = shalt.err (!%p35_p4)  }
   0xb   :  { %16 = dma.vmem_to_hbm [thread:$0]  %s14_s8, 128, %s66_s1, [#allocation2] }
   0xc   :  { %47 = dma.done.wait [#allocation2], 128 }
   0xd   :  { %48 = vsyncadd [#allocation2], 4294967168 }
   0xe   :  { %20 = vsyncmov [#allocation2] }
  0x11   :  { %s21_s13 = vpop.sfrf %20 }
  0x12   :  { %p26_p5 = scmp.ne.s32.totalorder %s21_s13, 0 }
  0x14   :  { %25 = shalt.err (%p26_p5)  }

</bundles_post_ra>
